<compile_context>
chip_gen: v6e
topology: v6e:2x2x1
jax: 0.10.0
libtpu: 0.0.40
codegen_flags: <defaults>
</compile_context>

<pallas_src>
import math
import functools

import jax
import jax.numpy as jnp
from jax.experimental import pallas as pl
from jax.experimental.pallas import tpu as pltpu


# ---------------------------------------------------------------------------
# Kernels (accumulate directly into the k-invariant, VMEM-resident output)
# ---------------------------------------------------------------------------

def _uf_linear_kernel_bias(x_ref, w_ref, b_ref, o_ref):
    # x_ref: (tm, tk)  w_ref: (tk, tn)  b_ref: (1, tn) f32  o_ref: (tm, tn) f32
    k = pl.program_id(2)

    @pl.when(k == 0)
    def _():
        o_ref[...] = jnp.zeros_like(o_ref)

    o_ref[...] += jnp.dot(
        x_ref[...], w_ref[...], preferred_element_type=jnp.float32
    )

    @pl.when(k == pl.num_programs(2) - 1)
    def _():
        # Bias applied exactly once, off the hot K loop.
        o_ref[...] += b_ref[...]


def _uf_linear_kernel_nobias(x_ref, w_ref, o_ref):
    k = pl.program_id(2)

    @pl.when(k == 0)
    def _():
        o_ref[...] = jnp.zeros_like(o_ref)

    o_ref[...] += jnp.dot(
        x_ref[...], w_ref[...], preferred_element_type=jnp.float32
    )


# ---------------------------------------------------------------------------
# Tiling helpers
# ---------------------------------------------------------------------------

def _round_up(x, m):
    return ((x + m - 1) // m) * m


def _pick_nk_tiles(N, K, use_bf16):
    # Lane-dense (multiple-of-128) N / K tiles. tk=2048 bf16 has the same VMEM
    # footprint as tk=1024 f32 but halves the number of K steps (fewer f32
    # accumulator read-modify-writes contending for vld/vst slots).
    tn = min(512, _round_up(N, 128))
    tk = min(2048 if use_bf16 else 1024, _round_up(K, 128))
    return tn, tk


def _pick_m_tile(B, use_bf16):
    # bf16 packs two rows per sublane -> align tm to 16 to avoid masked loads.
    m_align = 16 if use_bf16 else 8
    return min(512, _round_up(B, m_align))


# ---------------------------------------------------------------------------
# One-time parameter preparation (hoisted transpose / pad / cast)
# ---------------------------------------------------------------------------

def prepare_uf_linear_params(weight, bias=None, use_bf16=True):
    """Transpose weight to (K, N), pad to tile multiples and (optionally) cast
    to bf16 ONCE. Reuse the result across forwards via
    `uf_linear_forward_prepared`."""
    N, K = weight.shape
    tn, tk = _pick_nk_tiles(N, K, use_bf16)
    Np, Kp = _round_up(N, tn), _round_up(K, tk)

    w_t = jnp.transpose(weight)                                 # (K, N)
    w_p = jnp.pad(w_t, ((0, Kp - K), (0, Np - N)))              # (Kp, Np)
    if use_bf16:
        w_p = w_p.astype(jnp.bfloat16)

    b_p = None
    if bias is not None:
        # Bias stays f32: added once to the f32 accumulator (exact).
        b_p = jnp.pad(bias, (0, Np - N)).astype(jnp.float32).reshape(1, Np)
    return w_p, b_p, N, K


# ---------------------------------------------------------------------------
# Forward
# ---------------------------------------------------------------------------

@functools.partial(jax.jit, static_argnames=("N", "K", "use_bf16"))
def uf_linear_forward_prepared(x, w_p, b_p, *, N, K, use_bf16=True):
    """x: (B, K) f32.  w_p/b_p from prepare_uf_linear_params.  Returns (B, N) f32."""
    B = x.shape[0]
    Kp, Np = w_p.shape

    tm = _pick_m_tile(B, use_bf16)
    tn, tk = _pick_nk_tiles(N, K, use_bf16)
    Bp = _round_up(B, tm)

    # Zero-pad the activation (zeros along K add nothing; padded rows are
    # sliced off) and cast the MXU operand dtype.
    x_p = jnp.pad(x, ((0, Bp - B), (0, Kp - K)))
    if use_bf16:
        x_p = x_p.astype(jnp.bfloat16)

    grid = (Bp // tm, Np // tn, Kp // tk)
    in_bytes = x_p.dtype.itemsize
    cost = pl.CostEstimate(
        flops=2 * B * N * K,
        transcendentals=0,
        bytes_accessed=in_bytes * (B * K + K * N) + 4 * (B * N + N),
    )
    cparams = pltpu.CompilerParams(
        # M / N parallel (megacore / v7x dual-TC split), K reduction last.
        dimension_semantics=("parallel", "parallel", "arbitrary"),
    )

    x_spec = pl.BlockSpec((tm, tk), lambda i, j, k: (i, k))
    w_spec = pl.BlockSpec((tk, tn), lambda i, j, k: (k, j))
    o_spec = pl.BlockSpec((tm, tn), lambda i, j, k: (i, j))
    # Output stays f32: it doubles as the MXU accumulator (no scratch needed).
    out_shape = jax.ShapeDtypeStruct((Bp, Np), jnp.float32)

    if b_p is not None:
        b_spec = pl.BlockSpec((1, tn), lambda i, j, k: (0, j))
        out_p = pl.pallas_call(
            _uf_linear_kernel_bias,
            out_shape=out_shape,
            grid_spec=pltpu.PrefetchScalarGridSpec(
                num_scalar_prefetch=0,
                grid=grid,
                in_specs=[x_spec, w_spec, b_spec],
                out_specs=o_spec,
            ),
            compiler_params=cparams,
            cost_estimate=cost,
        )(x_p, w_p, b_p)
    else:
        out_p = pl.pallas_call(
            _uf_linear_kernel_nobias,
            out_shape=out_shape,
            grid_spec=pltpu.PrefetchScalarGridSpec(
                num_scalar_prefetch=0,
                grid=grid,
                in_specs=[x_spec, w_spec],
                out_specs=o_spec,
            ),
            compiler_params=cparams,
            cost_estimate=cost,
        )(x_p, w_p)

    return out_p[:B, :N]


def uf_linear_forward(x, weight, weight_fb, bias=None, *, use_bf16=True):
    """Module-style convenience wrapper mirroring UfLinear.forward.

    NOTE: this re-prepares (transposes/pads/casts) the weight on every call;
    for repeated forwards call `prepare_uf_linear_params` once and use
    `uf_linear_forward_prepared`.
    """
    del weight_fb  # only used in the backward pass of UfLinearFunc
    B, K = x.shape
    N, K2 = weight.shape
    assert K == K2, "in_features mismatch"
    w_p, b_p, N, K = prepare_uf_linear_params(weight, bias, use_bf16)
    return uf_linear_forward_prepared(x, w_p, b_p, N=N, K=K, use_bf16=use_bf16)


# ---------------------------------------------------------------------------
# Parameter init (mirrors the PyTorch module's reset_parameters)
# ---------------------------------------------------------------------------

def init_uf_linear_params(key, in_features, out_features, use_bias=True):
    kw, kwfb, kb = jax.random.split(key, 3)
    # kaiming_uniform_(a=sqrt(5)) -> uniform(-bound, bound), bound = 1/sqrt(fan_in)
    bound = 1.0 / math.sqrt(in_features)
    weight = jax.random.uniform(
        kw, (out_features, in_features), jnp.float32, -bound, bound)
    weight_fb = jax.random.uniform(
        kwfb, (out_features, in_features), jnp.float32, -bound, bound)
    bias = None
    if use_bias:
        bias = jax.random.uniform(
            kb, (out_features,), jnp.float32, -bound, bound)
    return weight, weight_fb, bias


if __name__ == "__main__":
    key = jax.random.PRNGKey(0)
    k_x, k_p = jax.random.split(key)

    batch = 8
    in_features = 32
    out_features = 16

    x = jax.random.normal(k_x, (batch, in_features), jnp.float32)
    weight, weight_fb, bias = init_uf_linear_params(
        k_p, in_features, out_features, use_bias=True)
    ref = x @ weight.T + bias[None, :]
    ref_nb = x @ weight.T

    # Fast path: prepared (transposed/padded/bf16-cast) weight, f32 accumulate.
    w_p, b_p, N, K = prepare_uf_linear_params(weight, bias, use_bf16=True)
    out = uf_linear_forward_prepared(x, w_p, b_p, N=N, K=K, use_bf16=True)
    out = jax.block_until_ready(out)
    assert out.shape == (batch, out_features)
    assert jnp.allclose(out, ref, atol=2e-2, rtol=2e-2), "bf16 path mismatch"

    # Exact f32 path (module-style wrapper), with and without bias.
    out_f32 = jax.block_until_ready(
        uf_linear_forward(x, weight, weight_fb, bias, use_bf16=False))
    assert jnp.allclose(out_f32, ref, atol=1e-5, rtol=1e-5), "f32 bias mismatch"

    out_nb = jax.block_until_ready(
        uf_linear_forward(x, weight, weight_fb, None, use_bf16=False))
    assert jnp.allclose(out_nb, ref_nb, atol=1e-5, rtol=1e-5), "f32 no-bias mismatch"

    print("KERNEL_OK")
</pallas_src>

<mosaic_0001>
module attributes {stable_mosaic.version = 11 : i64} {
  func.func @_uf_linear_kernel_bias(%arg0: i32, %arg1: i32, %arg2: i32, %arg3: memref<16x128xbf16, #tpu.memory_space<vmem>>, %arg4: memref<128x128xbf16, #tpu.memory_space<vmem>>, %arg5: memref<1x128xf32, #tpu.memory_space<vmem>>, %arg6: memref<16x128xf32, #tpu.memory_space<vmem>>) attributes {dimension_semantics = [#tpu.dimension_semantics<parallel>, #tpu.dimension_semantics<parallel>, #tpu.dimension_semantics<arbitrary>], iteration_bounds = array<i64: 1, 1, 1>, scalar_prefetch = 0 : i64, scratch_operands = 0 : i64, tpu.core_type = #tpu.core_type<tc>, window_params = [{transform_indices = @transform_0, window_bounds = array<i64: 16, 128>}, {transform_indices = @transform_1, window_bounds = array<i64: 128, 128>}, {transform_indices = @transform_2, window_bounds = array<i64: 1, 128>}, {transform_indices = @transform_3, window_bounds = array<i64: 16, 128>}]} {
    %c0_i32 = arith.constant 0 : i32
    %0 = arith.cmpi eq, %arg2, %c0_i32 : i32
    %1 = arith.extui %0 : i1 to i32
    %c0_i32_0 = arith.constant 0 : i32
    %2 = arith.cmpi ne, %1, %c0_i32_0 : i32
    scf.if %2 {
      %cst_10 = arith.constant 0.000000e+00 : f32
      %12 = vector.broadcast %cst_10 : f32 to vector<16x128xf32>
      %c0_11 = arith.constant 0 : index
      %c0_12 = arith.constant 0 : index
      %13 = vector.load %arg6[%c0_11, %c0_12] : memref<16x128xf32, #tpu.memory_space<vmem>>, vector<16x128xf32>
      tpu.vector_store %arg6[%c0_11, %c0_12], %12 {strides = array<i32>} : memref<16x128xf32, #tpu.memory_space<vmem>>, vector<16x128xf32>,
    } else {
    }
    %c0 = arith.constant 0 : index
    %c0_1 = arith.constant 0 : index
    %3 = vector.load %arg6[%c0, %c0_1] : memref<16x128xf32, #tpu.memory_space<vmem>>, vector<16x128xf32>
    %c0_2 = arith.constant 0 : index
    %c0_3 = arith.constant 0 : index
    %4 = vector.load %arg3[%c0_2, %c0_3] : memref<16x128xbf16, #tpu.memory_space<vmem>>, vector<16x128xbf16>
    %c0_4 = arith.constant 0 : index
    %c0_5 = arith.constant 0 : index
    %5 = vector.load %arg4[%c0_4, %c0_5] : memref<128x128xbf16, #tpu.memory_space<vmem>>, vector<128x128xbf16>
    %cst = arith.constant dense<0.000000e+00> : vector<16x128xf32>
    %6 = tpu.matmul %4, %5, %cst {dimension_numbers = #tpu.dot_dimension_numbers<[1], [0], [0], [1], [0, 0, 1, 1], [], []>} : vector<16x128xbf16>, vector<128x128xbf16>, vector<16x128xf32> -> vector<16x128xf32>
    %7 = arith.addf %3, %6 : vector<16x128xf32>
    %c0_6 = arith.constant 0 : index
    %c0_7 = arith.constant 0 : index
    %8 = vector.load %arg6[%c0_6, %c0_7] : memref<16x128xf32, #tpu.memory_space<vmem>>, vector<16x128xf32>
    tpu.vector_store %arg6[%c0_6, %c0_7], %7 {strides = array<i32>} : memref<16x128xf32, #tpu.memory_space<vmem>>, vector<16x128xf32>,
    %c0_i32_8 = arith.constant 0 : i32
    %9 = arith.cmpi eq, %arg2, %c0_i32_8 : i32
    %10 = arith.extui %9 : i1 to i32
    %c0_i32_9 = arith.constant 0 : i32
    %11 = arith.cmpi ne, %10, %c0_i32_9 : i32
    scf.if %11 {
      %c0_10 = arith.constant 0 : index
      %c0_11 = arith.constant 0 : index
      %12 = vector.load %arg6[%c0_10, %c0_11] : memref<16x128xf32, #tpu.memory_space<vmem>>, vector<16x128xf32>
      %c0_12 = arith.constant 0 : index
      %c0_13 = arith.constant 0 : index
      %13 = vector.load %arg5[%c0_12, %c0_13] : memref<1x128xf32, #tpu.memory_space<vmem>>, vector<1x128xf32>
      %14 = vector.broadcast %13 : vector<1x128xf32> to vector<16x128xf32>
      %15 = arith.addf %12, %14 : vector<16x128xf32>
      %c0_14 = arith.constant 0 : index
      %c0_15 = arith.constant 0 : index
      %16 = vector.load %arg6[%c0_14, %c0_15] : memref<16x128xf32, #tpu.memory_space<vmem>>, vector<16x128xf32>
      tpu.vector_store %arg6[%c0_14, %c0_15], %15 {strides = array<i32>} : memref<16x128xf32, #tpu.memory_space<vmem>>, vector<16x128xf32>,
    } else {
    }
    return
  }
  func.func @transform_0(%arg0: i32, %arg1: i32, %arg2: i32) -> (i32, i32) {
    %c0_i32 = arith.constant 0 : i32
    return %arg0, %arg2 : i32, i32
  }
  func.func @transform_1(%arg0: i32, %arg1: i32, %arg2: i32) -> (i32, i32) {
    %c0_i32 = arith.constant 0 : i32
    return %arg2, %arg1 : i32, i32
  }
  func.func @transform_2(%arg0: i32, %arg1: i32, %arg2: i32) -> (i32, i32) {
    %c0_i32 = arith.constant 0 : i32
    %c0_i32_0 = arith.constant 0 : i32
    return %c0_i32, %arg1 : i32, i32
  }
  func.func @transform_3(%arg0: i32, %arg1: i32, %arg2: i32) -> (i32, i32) {
    %c0_i32 = arith.constant 0 : i32
    return %arg0, %arg1 : i32, i32
  }
}

</mosaic_0001>

<bundles_post_ra>
// kernel: uf_linear_forward_prepared.1
= control target key start
LH: loop header
LB: loop body
LE: loop exit
PB: predicated region body
PF: predicated region fallthrough
CT: control target
= control target key end

     0   :  { %8 = vsyncpa [#allocation3], 0  ;;  %s250_s12 = smov [#allocation2]   ;;  %s290_s0 = inlined_call_operand.vmem [shape: bf16[16,128], index: 0, kind: input, shape index: {}]   ;;  %s291_s1 = inlined_call_operand.hbm [shape: bf16[128,128], index: 1, kind: input, shape index: {}]   ;;  %s292_s2 = inlined_call_operand.vmem [shape: f32[1,128], index: 2, kind: input, shape index: {}]   ;;  %s293_s3 = inlined_call_operand.vmem [shape: f32[16,128], index: 3, kind: output, shape index: {}]  }
   0x1   :  { %s16_s13 = sshll.u32 %s250_s12, 4  ;;  %s17_s13 = int_to_ptr.vmem [resolvable:$true] %s16_s13 }
   0x2   :  { %s236_s14 = scalar_lea.vmem %s17_s13, 1024  ;;  %p241_p1 = scmp.lt.s32.totalorder %s17_s13, %s17_s13 }
   0x3   :  { %p237_p0 = scmp.ne.s32.totalorder %s17_s13, %s236_s14  ;;  %p242_p2 = scmp.lt.s32.totalorder %s236_s14, %s236_s14 }
   0x5   :  { %p243_p3 = por %p242_p2, %p241_p1 }
   0x7   :  { %p244_p4 = pnand %p243_p3, %p237_p0 }
   0x9   :  { %247 = shalt.err (!%p244_p4)
}
   0xa   :  { %s251_s15 = smov 64   ;;  %s252_s16 = smov 4  }
   0xb   :  { %22 = dma.hbm_to_vmem [thread:$0]  %s291_s1, 1024, %s17_s13, [#allocation3], %s251_s15, %s251_s15, %s252_s16  }
   0xc   :  { %248 = dma.done.wait [#allocation3], 1024  }
   0xd   :  { %249 = vsyncadd [#allocation3], 4294966272  ;;  %v253_v0 = vmov 0.0   ;;  %vm254_vm0 = vmmov 0   ;;  %v219_v1 = vld [vmem:[#allocation2 + $0x38] sm:$0xff]   ;;  %v220_v2 = vld [vmem:[#allocation2 + $0x30] sm:$0xff]  }
   0xe   :  { %194 = vmatprep.subr.bf16.mxu0 %v253_v0  ;;  %210 = vmatprep.mubr.msk.bf16.mxu0 %vm254_vm0, %v253_v0  ;;  %v221_v3 = vld [vmem:[#allocation2 + $0x28] sm:$0xff]   ;;  %v222_v4 = vld [vmem:[#allocation2 + $0x20] sm:$0xff]   ;;  %v223_v5 = vld [vmem:[#allocation2 + $0x18] sm:$0xff]  }
   0xf   :  { %195 = vmatpush3.bf16.msra.mxu0 %v219_v1  ;;  %v224_v6 = vld [vmem:[#allocation2 + $0x10] sm:$0xff]   ;;  %v225_v7 = vld [vmem:[#allocation2 + $0x8] sm:$0xff]   ;;  %v226_v8 = vld [vmem:[#allocation2] sm:$0xff]  }
  0x10   :  { %196 = vmatprep.subr.bf16.mxu0 %v253_v0  ;;  %v227_v9 = vld [vmem:[%s290_s0] sm:$0xff]  }
  0x11   :  { %v184_v11 = vld [vmem:[%s292_s2] ss:$0 sm:$0xff] }
  0x13   :  { %197 = vmatpush3.bf16.msra.mxu0 %v220_v2 }
  0x14   :  { %198 = vmatprep.subr.bf16.mxu0 %v253_v0 }
  0x17   :  { %199 = vmatpush3.bf16.msra.mxu0 %v221_v3 }
  0x18   :  { %200 = vmatprep.subr.bf16.mxu0 %v253_v0 }
  0x1b   :  { %201 = vmatpush3.bf16.msra.mxu0 %v222_v4 }
  0x1c   :  { %202 = vmatprep.subr.bf16.mxu0 %v253_v0 }
  0x1f   :  { %203 = vmatpush3.bf16.msra.mxu0 %v223_v5 }
  0x20   :  { %204 = vmatprep.subr.bf16.mxu0 %v253_v0 }
  0x23   :  { %205 = vmatpush3.bf16.msra.mxu0 %v224_v6 }
  0x24   :  { %206 = vmatprep.subr.bf16.mxu0 %v253_v0 }
  0x27   :  { %207 = vmatpush3.bf16.msra.mxu0 %v225_v7 }
  0x28   :  { %208 = vmatprep.subr.bf16.mxu0 %v253_v0 }
  0x2b   :  { %209 = vmatpush3.bf16.msra.mxu0 %v226_v8 }
  0x2e   :  { %211 = vmatmul.mubr.bf16.vlgmr.msra.gmra.mxu0 %v227_v9 }
  0xee   :  { %v143_v10 = vpop.f32.mrf.mxu0 }
  0xef   :  { %v166_v13 = vadd.f32 %v184_v11, %v143_v10 }
  0xf0   :  { %v212_v12 = vpop.f32.mrf.mxu0 }
  0xf1   :  { %168 = vst [vmem:[%s293_s3] sm:$0xff] %v166_v13 }
  0xf2   :  { %v146_v14 = vpop.f32.mrf.mxu0 }
  0xf3   :  { %v167_v16 = vadd.f32 %v184_v11, %v146_v14 }
  0xf4   :  { %v213_v15 = vpop.f32.mrf.mxu0 }
  0xf5   :  { %169 = vst [vmem:[%s293_s3 + $0x8] sm:$0xff] %v167_v16 }
  0xf6   :  { %174 = vsyncpa [#allocation3], 1 }

</bundles_post_ra>
